<compile_context>
chip_gen: v7x
topology: tpu7x:2x2x1
jax: 0.10.0
libtpu: 0.0.40
codegen_flags: <defaults>
</compile_context>

<pallas_src>
import functools

import jax
import jax.numpy as jnp
from jax.experimental import pallas as pl
from jax.experimental.pallas import tpu as pltpu

ALPHA = 0.7
BETA = 0.3
GAMMA = 2.0
SMOOTH = 1e-6

_LANES = 128
# 2048 * 128 * 4 B = 1 MiB per input per pipeline buffer -> ~4 MiB double
# buffered: fits v5e's 16 MiB scoped-VMEM default and is past the point where
# per-step overhead stops mattering on v6e/v7x.
_MAX_BLOCK_ROWS = 2048


def _round_up(x, m):
    return ((x + m - 1) // m) * m


def _ftl_partial_kernel(pred_ref, true_ref, out_ref, *,
                        block_rows, n_valid, needs_mask):
    """Emit per-block, per-lane partial sums [sum(p*t), sum(p), sum(t)]."""
    x = pred_ref[...].astype(jnp.float32)
    t = true_ref[...].astype(jnp.float32)
    # sigmoid(x) == 0.5 * (tanh(x/2) + 1): a single EUP transcendental.
    p = 0.5 * (jnp.tanh(0.5 * x) + 1.0)

    if needs_mask:
        # Mask tail-pad / ragged-block elements (global element index >= n).
        i = pl.program_id(0)
        row = jax.lax.broadcasted_iota(jnp.int32, x.shape, 0)
        col = jax.lax.broadcasted_iota(jnp.int32, x.shape, 1)
        gidx = (i * block_rows + row) * _LANES + col  # int32 ok for n < 2**31
        valid = gidx < n_valid
        p = jnp.where(valid, p, 0.0)
        t = jnp.where(valid, t, 0.0)

    blk = jnp.concatenate([
        jnp.sum(p * t, axis=0, keepdims=True),
        jnp.sum(p, axis=0, keepdims=True),
        jnp.sum(t, axis=0, keepdims=True),
    ], axis=0)                          # (3, 128)
    out_ref[...] = blk[None]            # (1, 3, 128)


def focal_tversky_loss(y_pred, y_true, alpha=ALPHA, beta=BETA,
                       gamma=GAMMA, smooth=SMOOTH):
    """Pallas implementation of FocalTverskyLoss.forward (returns f32 scalar)."""
    pred_flat = jnp.reshape(y_pred, (-1,))   # native dtype; kernel casts to f32
    true_flat = jnp.reshape(y_true, (-1,))
    n = pred_flat.shape[0]

    rows = -(-n // _LANES)
    lane_pad = rows * _LANES - n
    if lane_pad:
        # Only a <128-element tail pad; padded entries are masked in-kernel.
        pred_flat = jnp.pad(pred_flat, (0, lane_pad))
        true_flat = jnp.pad(true_flat, (0, lane_pad))

    pred2d = pred_flat.reshape(rows, _LANES)
    true2d = true_flat.reshape(rows, _LANES)

    block_rows = min(_MAX_BLOCK_ROWS, _round_up(rows, 8))
    num_blocks = -(-rows // block_rows)
    needs_mask = (n % (block_rows * _LANES)) != 0

    kernel = functools.partial(_ftl_partial_kernel, block_rows=block_rows,
                               n_valid=n, needs_mask=needs_mask)

    partials = pl.pallas_call(
        kernel,
        out_shape=jax.ShapeDtypeStruct((num_blocks, 3, _LANES), jnp.float32),
        grid_spec=pltpu.PrefetchScalarGridSpec(
            num_scalar_prefetch=0,
            grid=(num_blocks,),
            in_specs=[
                pl.BlockSpec((block_rows, _LANES), lambda i: (i, 0)),
                pl.BlockSpec((block_rows, _LANES), lambda i: (i, 0)),
            ],
            out_specs=pl.BlockSpec((1, 3, _LANES), lambda i: (i, 0, 0)),
        ),
        compiler_params=pltpu.CompilerParams(
            dimension_semantics=("parallel",)),  # independent per-block outputs
    )(pred2d, true2d)

    # Tiny finalize in plain JAX: derive FP/FN from the three sums.
    tp = jnp.sum(partials[:, 0, :])
    sum_p = jnp.sum(partials[:, 1, :])
    sum_t = jnp.sum(partials[:, 2, :])
    fp = sum_p - tp          # == sum(p * (1 - t))
    fn = sum_t - tp          # == sum((1 - p) * t)
    tversky = (tp + smooth) / (tp + alpha * fn + beta * fp + smooth)
    return (1.0 - tversky) ** gamma


def _reference_loss(y_pred, y_true, alpha=ALPHA, beta=BETA,
                    gamma=GAMMA, smooth=SMOOTH):
    p = jax.nn.sigmoid(y_pred.astype(jnp.float32)).reshape(-1)
    t = y_true.astype(jnp.float32).reshape(-1)
    tp = jnp.sum(p * t)
    fp = jnp.sum(p * (1.0 - t))
    fn = jnp.sum((1.0 - p) * t)
    tv = (tp + smooth) / (tp + alpha * fn + beta * fp + smooth)
    return (1.0 - tv) ** gamma


if __name__ == "__main__":
    key = jax.random.PRNGKey(0)
    k_pred, k_true = jax.random.split(key)

    # y_pred: logits (pre-sigmoid); y_true: binary mask.  NCHW = [2, 4, 16, 16].
    y_pred = jax.random.normal(k_pred, (2, 4, 16, 16), dtype=jnp.float32)
    y_true = (jax.random.uniform(k_true, (2, 4, 16, 16)) > 0.5).astype(
        jnp.float32)

    loss = focal_tversky_loss(y_pred, y_true)
    jax.block_until_ready(loss)
    ref = _reference_loss(y_pred, y_true)
    assert jnp.allclose(loss, ref, atol=1e-5, rtol=1e-5), (loss, ref)

    # Ragged shape exercising the tail-pad + in-kernel mask path.
    k2p, k2t = jax.random.split(jax.random.PRNGKey(0))
    y_pred2 = jax.random.normal(k2p, (1, 3, 7, 13), dtype=jnp.float32)
    y_true2 = (jax.random.uniform(k2t, (1, 3, 7, 13)) > 0.5).astype(jnp.float32)
    loss2 = focal_tversky_loss(y_pred2, y_true2)
    jax.block_until_ready(loss2)
    ref2 = _reference_loss(y_pred2, y_true2)
    assert jnp.allclose(loss2, ref2, atol=1e-5, rtol=1e-5), (loss2, ref2)

    print("KERNEL_OK")
</pallas_src>

<mosaic_0001>
module attributes {stable_mosaic.version = 11 : i64} {
  func.func @_ftl_partial_kernel(%arg0: i32, %arg1: memref<16x128xf32, #tpu.memory_space<vmem>>, %arg2: memref<16x128xf32, #tpu.memory_space<vmem>>, %arg3: memref<1x3x128xf32, #tpu.memory_space<vmem>>) attributes {dimension_semantics = [#tpu.dimension_semantics<parallel>], iteration_bounds = array<i64: 1>, scalar_prefetch = 0 : i64, scratch_operands = 0 : i64, tpu.core_type = #tpu.core_type<tc>, window_params = [{transform_indices = @transform_0, window_bounds = array<i64: 16, 128>}, {transform_indices = @transform_1, window_bounds = array<i64: 16, 128>}, {transform_indices = @transform_2, window_bounds = array<i64: 1, 3, 128>}]} {
    %c0 = arith.constant 0 : index
    %c0_0 = arith.constant 0 : index
    %0 = vector.load %arg1[%c0, %c0_0] : memref<16x128xf32, #tpu.memory_space<vmem>>, vector<16x128xf32>
    %c0_1 = arith.constant 0 : index
    %c0_2 = arith.constant 0 : index
    %1 = vector.load %arg2[%c0_1, %c0_2] : memref<16x128xf32, #tpu.memory_space<vmem>>, vector<16x128xf32>
    %cst = arith.constant 5.000000e-01 : f32
    %2 = vector.broadcast %cst : f32 to vector<16x128xf32>
    %3 = arith.mulf %2, %0 : vector<16x128xf32>
    %4 = math.tanh %3 : vector<16x128xf32>
    %cst_3 = arith.constant 1.000000e+00 : f32
    %5 = vector.broadcast %cst_3 : f32 to vector<16x128xf32>
    %6 = arith.addf %4, %5 : vector<16x128xf32>
    %cst_4 = arith.constant 5.000000e-01 : f32
    %7 = vector.broadcast %cst_4 : f32 to vector<16x128xf32>
    %8 = arith.mulf %7, %6 : vector<16x128xf32>
    %9 = arith.mulf %8, %1 : vector<16x128xf32>
    %cst_5 = arith.constant dense<0.000000e+00> : vector<128xf32>
    %10 = vector.multi_reduction <add>, %9, %cst_5 [0] : vector<16x128xf32> to vector<128xf32>
    %11 = vector.shape_cast %10 : vector<128xf32> to vector<1x128xf32>
    %cst_6 = arith.constant dense<0.000000e+00> : vector<128xf32>
    %12 = vector.multi_reduction <add>, %8, %cst_6 [0] : vector<16x128xf32> to vector<128xf32>
    %13 = vector.shape_cast %12 : vector<128xf32> to vector<1x128xf32>
    %cst_7 = arith.constant dense<0.000000e+00> : vector<128xf32>
    %14 = vector.multi_reduction <add>, %1, %cst_7 [0] : vector<16x128xf32> to vector<128xf32>
    %15 = vector.shape_cast %14 : vector<128xf32> to vector<1x128xf32>
    %16 = tpu.concatenate %11, %13, %15 in 0 : vector<1x128xf32>, vector<1x128xf32>, vector<1x128xf32> -> vector<3x128xf32>
    %17 = vector.shape_cast %16 : vector<3x128xf32> to vector<1x3x128xf32>
    %c0_8 = arith.constant 0 : index
    %c0_9 = arith.constant 0 : index
    %c0_10 = arith.constant 0 : index
    %18 = vector.load %arg3[%c0_8, %c0_9, %c0_10] : memref<1x3x128xf32, #tpu.memory_space<vmem>>, vector<1x3x128xf32>
    tpu.vector_store %arg3[%c0_8, %c0_9, %c0_10], %17 {strides = array<i32>} : memref<1x3x128xf32, #tpu.memory_space<vmem>>, vector<1x3x128xf32>,
    return
  }
  func.func @transform_0(%arg0: i32) -> (i32, i32) {
    %c0_i32 = arith.constant 0 : i32
    %c0_i32_0 = arith.constant 0 : i32
    return %arg0, %c0_i32 : i32, i32
  }
  func.func @transform_1(%arg0: i32) -> (i32, i32) {
    %c0_i32 = arith.constant 0 : i32
    %c0_i32_0 = arith.constant 0 : i32
    return %arg0, %c0_i32 : i32, i32
  }
  func.func @transform_2(%arg0: i32) -> (i32, i32, i32) {
    %c0_i32 = arith.constant 0 : i32
    %c0_i32_0 = arith.constant 0 : i32
    %c0_i32_1 = arith.constant 0 : i32
    return %arg0, %c0_i32, %c0_i32_0 : i32, i32, i32
  }
}

</mosaic_0001>

<bundles_post_ra>
// kernel: tpu_custom_call.1
= control target key start
LH: loop header
LB: loop body
LE: loop exit
PB: predicated region body
PF: predicated region fallthrough
CT: control target
= control target key end

     0   :  { %7 = vsyncpa [#allocation3], 0  ;;  %s187_s0 = inlined_call_operand.hbm [shape: f32[16,128], index: 0, kind: input, shape index: {}]   ;;  %s188_s1 = inlined_call_operand.hbm [shape: f32[16,128], index: 1, kind: input, shape index: {}]   ;;  %s189_s2 = inlined_call_operand.vmem [shape: f32[1,3,128], index: 2, kind: output, shape index: {}]  }
   0x1   :  { %8 = vsyncpa [#allocation5], 0  ;;  %s141_s9 = smov [#allocation2]   ;;  %s93_s13 = scalar_lea.hbm %s187_s0, 256 }
   0x2   :  { %s14_s10 = sshll.u32 %s141_s9, 4  ;;  %p94_p0 = scmp.ne.s32.totalorder %s187_s0, %s93_s13  ;;  %s15_s10 = int_to_ptr.vmem [resolvable:$true] %s14_s10 }
   0x3   :  { %p97_p1 = scmp.lt.u32.totalorder %s93_s13, %s187_s0 }
   0x5   :  { %p99_p2 = pnand %p97_p1, %p94_p0 }
   0x7   :  { %102 = shalt.err (!%p99_p2)
}
   0x8   :  { %s103_s18 = scalar_lea.vmem %s15_s10, 256  ;;  %p108_p4 = scmp.lt.s32.totalorder %s15_s10, %s15_s10 }
   0x9   :  { %p104_p3 = scmp.ne.s32.totalorder %s15_s10, %s103_s18  ;;  %p109_p5 = scmp.lt.s32.totalorder %s103_s18, %s103_s18 }
   0xb   :  { %p110_p6 = por %p109_p5, %p108_p4 }
   0xd   :  { %p111_p7 = pnand %p110_p6, %p104_p3 }
   0xf   :  { %114 = shalt.err (!%p111_p7)
}
  0x10   :  { %s142_s19 = smov 128   ;;  %s143_s20 = smov 8  }
  0x11   :  { %20 = dma.hbm_to_vmem [thread:$0]  %s187_s0, 256, %s15_s10, [#allocation3], %s142_s19, %s142_s19, %s143_s20  }
  0x12   :  { %s144_s23 = smov [#allocation4]   ;;  %s115_s27 = scalar_lea.hbm %s188_s1, 256 }
  0x13   :  { %s26_s24 = sshll.u32 %s144_s23, 4  ;;  %p116_p8 = scmp.ne.s32.totalorder %s188_s1, %s115_s27  ;;  %s27_s24 = int_to_ptr.vmem [resolvable:$true] %s26_s24 }
  0x14   :  { %p119_p9 = scmp.lt.u32.totalorder %s115_s27, %s188_s1 }
  0x16   :  { %p121_p10 = pnand %p119_p9, %p116_p8 }
  0x18   :  { %124 = shalt.err (!%p121_p10)
}
  0x19   :  { %s125_s4 = scalar_lea.vmem %s27_s24, 256  ;;  %p130_p12 = scmp.lt.s32.totalorder %s27_s24, %s27_s24 }
  0x1a   :  { %p126_p11 = scmp.ne.s32.totalorder %s27_s24, %s125_s4  ;;  %p131_p13 = scmp.lt.s32.totalorder %s125_s4, %s125_s4 }
  0x1c   :  { %p132_p0 = por %p131_p13, %p130_p12 }
  0x1e   :  { %p133_p1 = pnand %p132_p0, %p126_p11 }
  0x20   :  { %136 = shalt.err (!%p133_p1)
}
  0x21   :  { %32 = dma.hbm_to_vmem [thread:$0]  %s188_s1, 256, %s27_s24, [#allocation5], %s142_s19, %s142_s19, %s143_s20  }
  0x22   :  { %137 = dma.done.wait [#allocation3], 256  }
  0x23   :  { %138 = vsyncadd [#allocation3], 4294967040 }
  0x24   :  { %139 = dma.done.wait [#allocation5], 256  }
  0x25   :  { %140 = vsyncadd [#allocation5], 4294967040  ;;  %v39_v0 = vld [vmem:[#allocation2] sm:$0xff]  ;;  %v40_v1 = vld [vmem:[#allocation2 + $0x8] sm:$0xff]  ;;  %vm74_vm0 = vcmask 1040384   ;;  %vm76_vm1 = vcmask 1041408  }
  0x26   :  { %v43_v2 = vmul.f32 0.5, %v39_v0  ;;  %v44_v3 = vmul.f32 0.5, %v40_v1  ;;  %v41_v4 = vld [vmem:[#allocation4] sm:$0xff]  ;;  %v42_v5 = vld [vmem:[#allocation4 + $0x8] sm:$0xff] }
  0x27   :  { %v67_v6 = vadd.f32 %v42_v5, %v41_v4 }
  0x28   :  { %89 = vtanh.f32 %v43_v2 }
  0x29   :  { %91 = vtanh.f32 %v44_v3  ;;  %v68_v7 = vrot.slane %v67_v6, 4 }
  0x2b   :  { %v69_v13 = vadd.f32 %v68_v7, %v67_v6 }
  0x2d   :  { %v70_v18 = vrot.slane %v69_v13, 2 }
  0x2f   :  { %v71_v23 = vadd.f32 %v70_v18, %v69_v13 }
  0x31   :  { %v72_v28 = vrot.slane %v71_v23, 1 }
  0x32   :  { %v90_v8 = vpop.eup %89 }
  0x33   :  { %v92_v9 = vpop.eup %91  ;;  %v47_v10 = vadd.f32 1.0, %v90_v8  ;;  %v73_v33 = vadd.f32 %v72_v28, %v71_v23 }
  0x34   :  { %v48_v11 = vadd.f32 1.0, %v92_v9 }
  0x35   :  { %v49_v12 = vmul.f32 0.5, %v47_v10 }
  0x36   :  { %v50_v14 = vmul.f32 0.5, %v48_v11 }
  0x37   :  { %v51_v15 = vmul.f32 %v49_v12, %v41_v4 }
  0x38   :  { %v52_v16 = vmul.f32 %v50_v14, %v42_v5  ;;  %v60_v17 = vadd.f32 %v50_v14, %v49_v12 }
  0x3a   :  { %v53_v19 = vadd.f32 %v52_v16, %v51_v15  ;;  %v61_v20 = vrot.slane %v60_v17, 4 }
  0x3c   :  { %v54_v21 = vrot.slane %v53_v19, 4  ;;  %v62_v22 = vadd.f32 %v61_v20, %v60_v17 }
  0x3e   :  { %v55_v24 = vadd.f32 %v54_v21, %v53_v19  ;;  %v63_v25 = vrot.slane %v62_v22, 2 }
  0x40   :  { %v56_v26 = vrot.slane %v55_v24, 2  ;;  %v64_v27 = vadd.f32 %v63_v25, %v62_v22 }
  0x42   :  { %v57_v29 = vadd.f32 %v56_v26, %v55_v24  ;;  %v65_v30 = vrot.slane %v64_v27, 1 }
  0x44   :  { %v58_v31 = vrot.slane %v57_v29, 1  ;;  %v66_v32 = vadd.f32 %v65_v30, %v64_v27 }
  0x46   :  { %v59_v34 = vadd.f32 %v58_v31, %v57_v29 }
  0x48   :  { %v75_v35 = vsel %vm74_vm0, %v59_v34, %v66_v32 }
  0x49   :  { %v77_v36 = vsel %vm76_vm1, %v75_v35, %v73_v33 }
  0x4a   :  { %78 = vst [vmem:[%s189_s2] sm:$0x7] %v77_v36 }
  0x4b   :  { %83 = vsyncpa [#allocation3], 1 }
  0x4c   :  { %84 = vsyncpa [#allocation5], 1 }

</bundles_post_ra>
